<compile_context>
chip_gen: v6e
topology: v6e:2x2x1
jax: 0.10.0
libtpu: 0.0.40
codegen_flags: <defaults>
</compile_context>

<pallas_src>
import jax
import jax.numpy as jnp
from jax import lax
from jax.experimental import pallas as pl
from jax.experimental.pallas import tpu as pltpu


def critic_v_kernel(s_ref, z_ref, w1a_ref, w1b_ref, b1_ref, w2_ref, b2_ref,
                    w3_ref, b3_ref, w4_ref, b4_ref, out_ref):
    """Fused 4-layer MLP: relu(fc1) -> relu(fc2) -> relu(fc3) -> fc4 (N=1).

    s_ref/z_ref: (TB, s_dim)/(TB, belief_dim) bf16 activation tiles.
    w*_ref/b*_ref: VMEM-resident bf16 weights / f32 bias rows; b4 is SMEM.
    out_ref: (1, 1, TB) f32, batch mapped to lanes (lane-dense store).
    """
    # fc1 with the HBM-side concat fused away: split-K over (state, belief);
    # both partial dots accumulate in the same f32 register tile.
    h = (jnp.dot(s_ref[...], w1a_ref[...], preferred_element_type=jnp.float32)
         + jnp.dot(z_ref[...], w1b_ref[...], preferred_element_type=jnp.float32)
         + b1_ref[...])
    h = jnp.maximum(h, 0.0)                                    # f32 VPU relu

    h = jnp.dot(h.astype(w2_ref.dtype), w2_ref[...],
                preferred_element_type=jnp.float32) + b2_ref[...]
    h = jnp.maximum(h, 0.0)

    h = jnp.dot(h.astype(w3_ref.dtype), w3_ref[...],
                preferred_element_type=jnp.float32) + b3_ref[...]
    h = jnp.maximum(h, 0.0)

    # fc4 (out_features == 1), lane-dense: (1, h) contracted with (TB, h) on h
    # -> (1, TB) with the batch on lanes.  b4 is a scalar SMEM read.
    val = lax.dot_general(
        w4_ref[...], h.astype(w4_ref.dtype),
        dimension_numbers=(((1,), (1,)), ((), ())),
        preferred_element_type=jnp.float32) + b4_ref[0, 0]
    out_ref[...] = val.reshape(1, 1, -1).astype(out_ref.dtype)


def prepare_kernel_params(params, s_dim, *, mxu_dtype=jnp.bfloat16):
    """Split/cast PyTorch-style params into the kernel layout.

    Input layout (matches the nn.Module): w_i is (fan_in, fan_out) already
    transposed for y = x @ W, biases are (1, fan_out) rows.
    """
    w1, b1, w2, b2, w3, b3, w4, b4 = params
    w1a = w1[:s_dim].astype(mxu_dtype)               # (s_dim, h)
    w1b = w1[s_dim:].astype(mxu_dtype)               # (belief_dim, h)
    w4_row = w4.reshape(1, -1).astype(mxu_dtype)     # (1, h) row for fc4
    b4 = b4.reshape(1, 1).astype(jnp.float32)        # scalar, lives in SMEM
    return (w1a, w1b, b1.astype(jnp.float32),
            w2.astype(mxu_dtype), b2.astype(jnp.float32),
            w3.astype(mxu_dtype), b3.astype(jnp.float32),
            w4_row, b4)


def _round_up(x, m):
    return ((x + m - 1) // m) * m


def _vmem_limit_bytes(tb, s_dim, belief_dim, h_dim):
    """Rough scoped-VMEM budget: resident weights + pipelined tiles + slack."""
    bf16, f32 = 2, 4
    acts = 2 * tb * (s_dim + belief_dim) * bf16                  # 2x buffered inputs
    weights = ((s_dim + belief_dim) * h_dim
               + 2 * h_dim * h_dim + h_dim) * bf16               # single-buffered
    biases = 3 * 8 * max(h_dim, 128) * f32                       # padded (1,h) rows
    inter = 6 * tb * max(h_dim, 128) * f32                       # live f32 tiles
    outb = 2 * 8 * max(tb, 128) * f32                            # 2x buffered output
    est = acts + weights + biases + inter + outb + (1 << 20)
    # 32 MiB floor (>= every chip's default scoped limit), 48 MiB ceiling
    # (safe under v7x's 64 MiB physical VMEM).
    return int(min(max(2 * est, 32 * 1024 * 1024), 48 * 1024 * 1024))


def critic_v_forward(state, belief, kernel_params, *, block_b=512,
                     act_dtype=jnp.bfloat16):
    """Fused forward pass. state: (B, s_dim), belief: (B, belief_dim)."""
    B, s_dim = state.shape
    belief_dim = belief.shape[1]
    (w1a, w1b, b1, w2, b2, w3, b3, w4_row, b4) = kernel_params
    h_dim = w2.shape[0]

    # Stream activations in bf16 (weights are VMEM-resident, so this halves
    # the recurring per-tile HBM read).  Ideally callers pass bf16 upstream.
    state = state.astype(act_dtype)
    belief = belief.astype(act_dtype)

    # Batch tile: multiple of 8 sublanes, <= block_b, and capped near B/2 so
    # the grid has >=2 steps (megacore sharding on v7x) whenever B > 8.
    tb_cap = max(8, (block_b // 8) * 8)
    tb_half = _round_up(pl.cdiv(B, 2), 8)
    TB = min(tb_cap, tb_half)
    grid_n = pl.cdiv(B, TB)

    # No full-array padding: the ragged last block's input DMA is clamped by
    # Pallas; the stale rows only feed output lanes >= B, sliced off below.
    def resident():  # whole array placed in VMEM once (single-buffered)
        return pl.BlockSpec(memory_space=pltpu.MemorySpace.VMEM)

    out = pl.pallas_call(
        critic_v_kernel,
        out_shape=jax.ShapeDtypeStruct((grid_n, 1, TB), jnp.float32),
        grid=(grid_n,),
        in_specs=[
            pl.BlockSpec((TB, s_dim), lambda i: (i, 0)),
            pl.BlockSpec((TB, belief_dim), lambda i: (i, 0)),
            resident(), resident(), resident(),      # w1a, w1b, b1
            resident(), resident(),                  # w2, b2
            resident(), resident(),                  # w3, b3
            resident(),                              # w4_row
            pl.BlockSpec(memory_space=pltpu.MemorySpace.SMEM),   # b4 scalar
        ],
        # Lane-dense output: one (1, 1, TB) row per grid step.
        out_specs=pl.BlockSpec((1, 1, TB), lambda i: (i, 0, 0)),
        compiler_params=pltpu.CompilerParams(
            dimension_semantics=("parallel",),       # megacore on v7x
            vmem_limit_bytes=_vmem_limit_bytes(TB, s_dim, belief_dim, h_dim)),
    )(state, belief, w1a, w1b, b1, w2, b2, w3, b3, w4_row, b4)

    # (grid_n, 1, TB) row-major == batch order; slice the ragged tail.
    return out.reshape(-1)[:B].reshape(B, 1)


def init_params(key, s_dim, belief_dim, h_dim):
    """Deterministic PyTorch-style (uniform +/- 1/sqrt(fan_in)) init, f32."""
    def linear(k, fan_in, fan_out):
        kw, kb = jax.random.split(k)
        bound = 1.0 / jnp.sqrt(float(fan_in))
        w = jax.random.uniform(kw, (fan_in, fan_out), jnp.float32, -bound, bound)
        b = jax.random.uniform(kb, (1, fan_out), jnp.float32, -bound, bound)
        return w, b

    k1, k2, k3, k4 = jax.random.split(key, 4)
    in_dim = s_dim + belief_dim
    w1, b1 = linear(k1, in_dim, h_dim)
    w2, b2 = linear(k2, h_dim, h_dim)
    w3, b3 = linear(k3, h_dim, h_dim)
    w4, b4 = linear(k4, h_dim, 1)
    return (w1, b1, w2, b2, w3, b3, w4, b4)


def reference_forward_f32(state, belief, params):
    """Pure-JAX f32 reference of Critic_V.forward (module semantics)."""
    w1, b1, w2, b2, w3, b3, w4, b4 = params
    x = jnp.concatenate([state, belief], axis=1)
    h = jax.nn.relu(x @ w1 + b1)
    h = jax.nn.relu(h @ w2 + b2)
    h = jax.nn.relu(h @ w3 + b3)
    return h @ w4 + b4


def reference_forward_matched(state, belief, kernel_params,
                              act_dtype=jnp.bfloat16):
    """Pure-JAX reference with the same bf16-operand / f32-accumulate math."""
    w1a, w1b, b1, w2, b2, w3, b3, w4_row, b4 = kernel_params
    s = state.astype(act_dtype)
    z = belief.astype(act_dtype)
    h = (jnp.dot(s, w1a, preferred_element_type=jnp.float32)
         + jnp.dot(z, w1b, preferred_element_type=jnp.float32) + b1)
    h = jax.nn.relu(h)
    h = jax.nn.relu(jnp.dot(h.astype(w2.dtype), w2,
                            preferred_element_type=jnp.float32) + b2)
    h = jax.nn.relu(jnp.dot(h.astype(w3.dtype), w3,
                            preferred_element_type=jnp.float32) + b3)
    return jnp.dot(h.astype(w4_row.dtype), w4_row.T,
                   preferred_element_type=jnp.float32) + b4[0, 0]


if __name__ == "__main__":
    # Small shapes consistent with Critic_V(s_dim, belief_dim, h_dim).
    # B=52 -> TB=32, grid=(2,): exercises 2-step (megacore-shardable) grid,
    # VMEM-resident weights across tiles, and a ragged last batch block.
    B, s_dim, belief_dim, h_dim = 52, 8, 24, 32

    key = jax.random.PRNGKey(0)
    k_state, k_belief, k_params = jax.random.split(key, 3)

    state = jax.random.normal(k_state, (B, s_dim), jnp.float32)
    belief = jax.random.normal(k_belief, (B, belief_dim), jnp.float32)
    params = init_params(k_params, s_dim, belief_dim, h_dim)
    kparams = prepare_kernel_params(params, s_dim)

    val = critic_v_forward(state, belief, kparams)
    val = jax.block_until_ready(val)
    assert val.shape == (B, 1), val.shape
    assert bool(jnp.all(jnp.isfinite(val))), "non-finite values in output"

    # Tight check vs. a reference doing the same bf16-operand math.
    ref_matched = reference_forward_matched(state, belief, kparams)
    assert jnp.allclose(val, ref_matched, atol=2e-3, rtol=2e-3), \
        "mismatch vs bf16-matched reference"

    # Loose sanity check vs. full-f32 module semantics (bf16 operand rounding).
    ref_f32 = reference_forward_f32(state, belief, params)
    assert jnp.allclose(val, ref_f32, atol=5e-2, rtol=5e-2), \
        "mismatch vs f32 module reference"

    print("KERNEL_OK")
</pallas_src>

<mosaic_0001>
module attributes {stable_mosaic.version = 11 : i64} {
  func.func @critic_v_kernel(%arg0: i32, %arg1: memref<32x8xbf16, #tpu.memory_space<vmem>>, %arg2: memref<32x24xbf16, #tpu.memory_space<vmem>>, %arg3: memref<8x32xbf16, #tpu.memory_space<vmem>>, %arg4: memref<24x32xbf16, #tpu.memory_space<vmem>>, %arg5: memref<1x32xf32, #tpu.memory_space<vmem>>, %arg6: memref<32x32xbf16, #tpu.memory_space<vmem>>, %arg7: memref<1x32xf32, #tpu.memory_space<vmem>>, %arg8: memref<32x32xbf16, #tpu.memory_space<vmem>>, %arg9: memref<1x32xf32, #tpu.memory_space<vmem>>, %arg10: memref<1x32xbf16, #tpu.memory_space<vmem>>, %arg11: memref<1x1xf32, #tpu.memory_space<smem>>, %arg12: memref<1x1x32xf32, #tpu.memory_space<vmem>>) attributes {dimension_semantics = [#tpu.dimension_semantics<parallel>], iteration_bounds = array<i64: 2>, scalar_prefetch = 0 : i64, scratch_operands = 0 : i64, tpu.core_type = #tpu.core_type<tc>, window_params = [{transform_indices = @transform_0, window_bounds = array<i64: 32, 8>}, {transform_indices = @transform_1, window_bounds = array<i64: 32, 24>}, {pipeline_mode = #tpu.pipeline_mode<synchronous>, transform_indices = @transform_2, window_bounds = array<i64: 8, 32>}, {pipeline_mode = #tpu.pipeline_mode<synchronous>, transform_indices = @transform_3, window_bounds = array<i64: 24, 32>}, {pipeline_mode = #tpu.pipeline_mode<synchronous>, transform_indices = @transform_4, window_bounds = array<i64: 1, 32>}, {pipeline_mode = #tpu.pipeline_mode<synchronous>, transform_indices = @transform_5, window_bounds = array<i64: 32, 32>}, {pipeline_mode = #tpu.pipeline_mode<synchronous>, transform_indices = @transform_6, window_bounds = array<i64: 1, 32>}, {pipeline_mode = #tpu.pipeline_mode<synchronous>, transform_indices = @transform_7, window_bounds = array<i64: 32, 32>}, {pipeline_mode = #tpu.pipeline_mode<synchronous>, transform_indices = @transform_8, window_bounds = array<i64: 1, 32>}, {pipeline_mode = #tpu.pipeline_mode<synchronous>, transform_indices = @transform_9, window_bounds = array<i64: 1, 32>}, {transform_indices = @transform_10, window_bounds = array<i64: 1, 1>}, {transform_indices = @transform_11, window_bounds = array<i64: 1, 1, 32>}]} {
    %c0 = arith.constant 0 : index
    %c0_0 = arith.constant 0 : index
    %0 = vector.load %arg1[%c0, %c0_0] : memref<32x8xbf16, #tpu.memory_space<vmem>>, vector<32x8xbf16>
    %c0_1 = arith.constant 0 : index
    %c0_2 = arith.constant 0 : index
    %1 = vector.load %arg3[%c0_1, %c0_2] : memref<8x32xbf16, #tpu.memory_space<vmem>>, vector<8x32xbf16>
    %cst = arith.constant dense<0.000000e+00> : vector<32x32xf32>
    %2 = tpu.matmul %0, %1, %cst {dimension_numbers = #tpu.dot_dimension_numbers<[1], [0], [0], [1], [0, 0, 1, 1], [], []>} : vector<32x8xbf16>, vector<8x32xbf16>, vector<32x32xf32> -> vector<32x32xf32>
    %c0_3 = arith.constant 0 : index
    %c0_4 = arith.constant 0 : index
    %3 = vector.load %arg2[%c0_3, %c0_4] : memref<32x24xbf16, #tpu.memory_space<vmem>>, vector<32x24xbf16>
    %c0_5 = arith.constant 0 : index
    %c0_6 = arith.constant 0 : index
    %4 = vector.load %arg4[%c0_5, %c0_6] : memref<24x32xbf16, #tpu.memory_space<vmem>>, vector<24x32xbf16>
    %cst_7 = arith.constant dense<0.000000e+00> : vector<32x32xf32>
    %5 = tpu.matmul %3, %4, %cst_7 {dimension_numbers = #tpu.dot_dimension_numbers<[1], [0], [0], [1], [0, 0, 1, 1], [], []>} : vector<32x24xbf16>, vector<24x32xbf16>, vector<32x32xf32> -> vector<32x32xf32>
    %6 = arith.addf %2, %5 : vector<32x32xf32>
    %c0_8 = arith.constant 0 : index
    %c0_9 = arith.constant 0 : index
    %7 = vector.load %arg5[%c0_8, %c0_9] : memref<1x32xf32, #tpu.memory_space<vmem>>, vector<1x32xf32>
    %8 = vector.broadcast %7 : vector<1x32xf32> to vector<32x32xf32>
    %9 = arith.addf %6, %8 : vector<32x32xf32>
    %cst_10 = arith.constant 0.000000e+00 : f32
    %10 = vector.broadcast %cst_10 : f32 to vector<32x32xf32>
    %11 = arith.maximumf %9, %10 : vector<32x32xf32>
    %12 = arith.truncf %11 : vector<32x32xf32> to vector<32x32xbf16>
    %c0_11 = arith.constant 0 : index
    %c0_12 = arith.constant 0 : index
    %13 = vector.load %arg6[%c0_11, %c0_12] : memref<32x32xbf16, #tpu.memory_space<vmem>>, vector<32x32xbf16>
    %cst_13 = arith.constant dense<0.000000e+00> : vector<32x32xf32>
    %14 = tpu.matmul %12, %13, %cst_13 {dimension_numbers = #tpu.dot_dimension_numbers<[1], [0], [0], [1], [0, 0, 1, 1], [], []>} : vector<32x32xbf16>, vector<32x32xbf16>, vector<32x32xf32> -> vector<32x32xf32>
    %c0_14 = arith.constant 0 : index
    %c0_15 = arith.constant 0 : index
    %15 = vector.load %arg7[%c0_14, %c0_15] : memref<1x32xf32, #tpu.memory_space<vmem>>, vector<1x32xf32>
    %16 = vector.broadcast %15 : vector<1x32xf32> to vector<32x32xf32>
    %17 = arith.addf %14, %16 : vector<32x32xf32>
    %cst_16 = arith.constant 0.000000e+00 : f32
    %18 = vector.broadcast %cst_16 : f32 to vector<32x32xf32>
    %19 = arith.maximumf %17, %18 : vector<32x32xf32>
    %20 = arith.truncf %19 : vector<32x32xf32> to vector<32x32xbf16>
    %c0_17 = arith.constant 0 : index
    %c0_18 = arith.constant 0 : index
    %21 = vector.load %arg8[%c0_17, %c0_18] : memref<32x32xbf16, #tpu.memory_space<vmem>>, vector<32x32xbf16>
    %cst_19 = arith.constant dense<0.000000e+00> : vector<32x32xf32>
    %22 = tpu.matmul %20, %21, %cst_19 {dimension_numbers = #tpu.dot_dimension_numbers<[1], [0], [0], [1], [0, 0, 1, 1], [], []>} : vector<32x32xbf16>, vector<32x32xbf16>, vector<32x32xf32> -> vector<32x32xf32>
    %c0_20 = arith.constant 0 : index
    %c0_21 = arith.constant 0 : index
    %23 = vector.load %arg9[%c0_20, %c0_21] : memref<1x32xf32, #tpu.memory_space<vmem>>, vector<1x32xf32>
    %24 = vector.broadcast %23 : vector<1x32xf32> to vector<32x32xf32>
    %25 = arith.addf %22, %24 : vector<32x32xf32>
    %cst_22 = arith.constant 0.000000e+00 : f32
    %26 = vector.broadcast %cst_22 : f32 to vector<32x32xf32>
    %27 = arith.maximumf %25, %26 : vector<32x32xf32>
    %c0_23 = arith.constant 0 : index
    %c0_24 = arith.constant 0 : index
    %28 = vector.load %arg10[%c0_23, %c0_24] : memref<1x32xbf16, #tpu.memory_space<vmem>>, vector<1x32xbf16>
    %29 = arith.truncf %27 : vector<32x32xf32> to vector<32x32xbf16>
    %cst_25 = arith.constant dense<0.000000e+00> : vector<1x32xf32>
    %30 = tpu.matmul %28, %29, %cst_25 {dimension_numbers = #tpu.dot_dimension_numbers<[1], [1], [0], [0], [0, 0, 1, 0], [], []>} : vector<1x32xbf16>, vector<32x32xbf16>, vector<1x32xf32> -> vector<1x32xf32>
    %c0_26 = arith.constant 0 : index
    %c0_27 = arith.constant 0 : index
    %31 = memref.load %arg11[%c0_26, %c0_27] : memref<1x1xf32, #tpu.memory_space<smem>>
    %32 = vector.broadcast %31 : f32 to vector<1x32xf32>
    %33 = arith.addf %30, %32 : vector<1x32xf32>
    %34 = vector.shape_cast %33 : vector<1x32xf32> to vector<1x1x32xf32>
    %c0_28 = arith.constant 0 : index
    %c0_29 = arith.constant 0 : index
    %c0_30 = arith.constant 0 : index
    %35 = vector.load %arg12[%c0_28, %c0_29, %c0_30] : memref<1x1x32xf32, #tpu.memory_space<vmem>>, vector<1x1x32xf32>
    tpu.vector_store %arg12[%c0_28, %c0_29, %c0_30], %34 {strides = array<i32>} : memref<1x1x32xf32, #tpu.memory_space<vmem>>, vector<1x1x32xf32>,
    return
  }
  func.func @transform_0(%arg0: i32) -> (i32, i32) {
    %c0_i32 = arith.constant 0 : i32
    %c0_i32_0 = arith.constant 0 : i32
    return %arg0, %c0_i32 : i32, i32
  }
  func.func @transform_1(%arg0: i32) -> (i32, i32) {
    %c0_i32 = arith.constant 0 : i32
    %c0_i32_0 = arith.constant 0 : i32
    return %arg0, %c0_i32 : i32, i32
  }
  func.func @transform_2(%arg0: i32) -> (i32, i32) {
    %c0_i32 = arith.constant 0 : i32
    %c0_i32_0 = arith.constant 0 : i32
    %c0_i32_1 = arith.constant 0 : i32
    return %c0_i32, %c0_i32_0 : i32, i32
  }
  func.func @transform_3(%arg0: i32) -> (i32, i32) {
    %c0_i32 = arith.constant 0 : i32
    %c0_i32_0 = arith.constant 0 : i32
    %c0_i32_1 = arith.constant 0 : i32
    return %c0_i32, %c0_i32_0 : i32, i32
  }
  func.func @transform_4(%arg0: i32) -> (i32, i32) {
    %c0_i32 = arith.constant 0 : i32
    %c0_i32_0 = arith.constant 0 : i32
    %c0_i32_1 = arith.constant 0 : i32
    return %c0_i32, %c0_i32_0 : i32, i32
  }
  func.func @transform_5(%arg0: i32) -> (i32, i32) {
    %c0_i32 = arith.constant 0 : i32
    %c0_i32_0 = arith.constant 0 : i32
    %c0_i32_1 = arith.constant 0 : i32
    return %c0_i32, %c0_i32_0 : i32, i32
  }
  func.func @transform_6(%arg0: i32) -> (i32, i32) {
    %c0_i32 = arith.constant 0 : i32
    %c0_i32_0 = arith.constant 0 : i32
    %c0_i32_1 = arith.constant 0 : i32
    return %c0_i32, %c0_i32_0 : i32, i32
  }
  func.func @transform_7(%arg0: i32) -> (i32, i32) {
    %c0_i32 = arith.constant 0 : i32
    %c0_i32_0 = arith.constant 0 : i32
    %c0_i32_1 = arith.constant 0 : i32
    return %c0_i32, %c0_i32_0 : i32, i32
  }
  func.func @transform_8(%arg0: i32) -> (i32, i32) {
    %c0_i32 = arith.constant 0 : i32
    %c0_i32_0 = arith.constant 0 : i32
    %c0_i32_1 = arith.constant 0 : i32
    return %c0_i32, %c0_i32_0 : i32, i32
  }
  func.func @transform_9(%arg0: i32) -> (i32, i32) {
    %c0_i32 = arith.constant 0 : i32
    %c0_i32_0 = arith.constant 0 : i32
    %c0_i32_1 = arith.constant 0 : i32
    return %c0_i32, %c0_i32_0 : i32, i32
  }
  func.func @transform_10(%arg0: i32) -> (i32, i32) {
    %c0_i32 = arith.constant 0 : i32
    %c0_i32_0 = arith.constant 0 : i32
    %c0_i32_1 = arith.constant 0 : i32
    return %c0_i32, %c0_i32_0 : i32, i32
  }
  func.func @transform_11(%arg0: i32) -> (i32, i32, i32) {
    %c0_i32 = arith.constant 0 : i32
    %c0_i32_0 = arith.constant 0 : i32
    %c0_i32_1 = arith.constant 0 : i32
    return %arg0, %c0_i32, %c0_i32_0 : i32, i32, i32
  }
}

</mosaic_0001>

<bundles_post_ra>
// kernel: tpu_custom_call.1
= control target key start
LH: loop header
LB: loop body
LE: loop exit
PB: predicated region body
PF: predicated region fallthrough
CT: control target
= control target key end

     0   :  { %s1345_s0 = inlined_call_operand.vmem [shape: bf16[52,8], index: 0, kind: input, shape index: {}]   ;;  %s1346_s1 = inlined_call_operand.vmem [shape: bf16[52,24], index: 1, kind: input, shape index: {}]   ;;  %s1347_s2 = inlined_call_operand.vmem [shape: bf16[8,32], index: 2, kind: input, shape index: {}]   ;;  %s1348_s3 = inlined_call_operand.vmem [shape: bf16[24,32], index: 3, kind: input, shape index: {}]   ;;  %s1349_s4 = inlined_call_operand.vmem [shape: f32[1,32], index: 4, kind: input, shape index: {}]   ;;  %s1350_s5 = inlined_call_operand.vmem [shape: bf16[32,32], index: 5, kind: input, shape index: {}]   ;;  %s1351_s6 = inlined_call_operand.vmem [shape: f32[1,32], index: 6, kind: input, shape index: {}]   ;;  %s1352_s7 = inlined_call_operand.vmem [shape: bf16[32,32], index: 7, kind: input, shape index: {}]   ;;  %s1353_s8 = inlined_call_operand.vmem [shape: f32[1,32], index: 8, kind: input, shape index: {}]   ;;  %s1354_s9 = inlined_call_operand.vmem [shape: bf16[1,32], index: 9, kind: input, shape index: {}]   ;;  %s1355_s10 = inlined_call_operand.<no memory space> [shape: f32[1,1], index: 10, kind: input, shape index: {}]   ;;  %s1356_s11 = inlined_call_operand.hbm [shape: f32[2,1,32], index: 11, kind: output, shape index: {}]  }
   0x1   :  { %16 = sst [smem:[#allocation2]] %s1355_s10 }
   0x2   :  { %17 = vsyncpa [#allocation4], 0 }
   0x3   :  { %19 = vsyncpa [#allocation4 + $0x1], 0  ;;  %s1200_s19 = smov 0   ;;  %s1202_s20 = smov 0  }
   0x4   :  { %s1204_s21 = smov 0   ;;  %s1206_s22 = smov 0  }
   0x5 LB: > { %s1221_s10 = sadd.s32 4294967295, %s1132_s22   ;;  %s930_s23 = sadd.s32 4294967294, %s1132_s22   ;;  %s1132_s22 = sphi %s1206_s22, %s1362_s22   ;;  %s1128_s21 = sphi %s1204_s21, %s1361_s21   ;;  %s1124_s20 = sphi %s1202_s20, %s1360_s20   ;;  %s1120_s19 = sphi %s1200_s19, %s1359_s19  }
   0x6   : > { %s1225_s24 = sadd.s32 1, %s1132_s22   ;;  %s273_s25 = sadd.s32 1, %s1128_s21 }
   0x7   : > { %s270_s26 = ssub.s32 %s1132_s22, %s1225_s24  ;;  %p283_p0 = scmp.ne.s32.totalorder %s1128_s21, %s1124_s20 }
   0x8   : > { %p271_p1 = scmp.eq.s32.totalorder %s270_s26, 0  ;;  %p284_p2 = scmp.eq.s32.totalorder %s1221_s10, 1 }
   0x9   : > { %p289_p3 = scmp.ne.s32.totalorder %s1124_s20, %s1120_s19  ;;  %p290_p4 = scmp.eq.s32.totalorder %s930_s23, 1 }
   0xa   : > { %s1236_s27 = scalar_select %p271_p1, %s1128_s21, %s273_s25  }
   0xb   : > { %p1238_p5 = por %p284_p2, %p283_p0  ;;  %p1242_p6 = por %p290_p4, %p289_p3 }
   0xc   : > { %p933_p7 = scmp.ge.s32.totalorder %s1132_s22, 1  ;;  %p369_p8 = scmp.lt.s32.totalorder %s1132_s22, 3 }
   0xe   : > { %p370_p9 = pnand %p933_p7, %p369_p8 }
   0xf   : > { %s934_s15 = sshll.u32 (!%p370_p9), %s1221_s10, 2  ;;  %s797_s23 = sld [smem:[#allocation2]] (!%p370_p9) }
  0x10   : > { %373 = sbr.rel (%p370_p9) target bundleno = 880 (0x370), region = 64  ;;  %p426_p10 = scmp.lt.s32.totalorder (!%p370_p9), %s934_s15, 6 }
  0x11   : > { %s419_s25 = sand.u32 (!%p370_p9), 1, %s1124_s20   ;;  %s1136_s17 = smov (!%p370_p9), [#allocation3]  }
  0x12   : > { %s420_s30 = scalar_lea.vmem (!%p370_p9), [#allocation3], %s419_s25  ;;  %s851_s16 = scalar_lea.sflag (!%p370_p9), [#allocation4], %s419_s25 }
  0x13   : > { %s863_s12 = sshll.u32 (!%p370_p9), %s420_s30, 4  ;;  %s1306_s12 = int_to_ptr.vmem [resolvable:$true] %s863_s12 }
  0x15   : > { %v1062_v0 = vld [vmem:[%s1348_s3 + $0x8] ss:$0 sps:$4 sm:$0xff]   ;;  %vm488_vm0 = vcmask 1043456   ;;  %v1063_v1 = vld [vmem:[%s1348_s3] sm:$0xff]   ;;  %s1364_s15 = smov (!%p426_p10, %s934_s15), 6  ;;  %vm481_vm1 = vcmask 195584  }
  0x16   : > { %1019 = vmatprep.subr.msk.bf16.mxu0 %vm488_vm0, %v1062_v0  ;;  %v490_v2 = vsel %vm488_vm0, %v1062_v0, 0  ;;  %v454_v3 = vld [vmem:[%s1347_s2] sm:$0xf]  ;;  %s935_s18 = sshll.u32 %s1364_s15, 2  ;;  %vm551_vm2 = vcmask 64512   ;;  %v1068_v9 = vld [vmem:[%s1350_s5 + $0x8] sm:$0xff]  }
  0x17   : > { %982 = vmatpush3.bf16.msra.mxu0 %v490_v2  ;;  %s429_s26 = scalar_lea.vmem %s1345_s0, %s935_s18  ;;  %s443_s13 = scalar_lea.vmem %s1346_s1, %s935_s18  ;;  %v559_v6 = vsel %vm488_vm0, %v454_v3, 0  ;;  %995 = vmatprep.subr.bf16.mxu1 %v1068_v9  ;;  %v1069_v10 = vld [vmem:[%s1350_s5] sm:$0xff]   ;;  %vm650_vm3 = vcmask 261120   ;;  %v1070_v34 = vld [vmem:[%s1352_s7 + $0x8] sm:$0xff]   ;;  %v1134_v51 = vmov 0.0   ;;  %vm1135_vm4 = vmmov 0  }
  0x18   : > { %983 = vmatprep.subr.bf16.mxu0 %v1063_v1  ;;  %v1064_v4 = vld [vmem:[%s443_s13] sm:$0xff]   ;;  %v1065_v5 = vld [vmem:[%s443_s13 + $0x8] sm:$0xff]   ;;  %996 = vmatpush3.bf16.msra.mxu1 %v1068_v9  ;;  %vm848_vm5 = vcmask 253952   ;;  %s1076_s18 = sshll.u32 %s1136_s17, 4  ;;  %s1077_s18 = int_to_ptr.vmem [resolvable:$false] %s1076_s18 }
  0x19   : > { %985 = vmatprep.mubr.msk.bf16.mxu0 %vm481_vm1, %v1064_v4  ;;  %v1066_v7 = vld [vmem:[%s429_s26] sm:$0xff]   ;;  %v1067_v8 = vld [vmem:[%s429_s26 + $0x8] sm:$0xff]   ;;  %997 = vmatprep.subr.bf16.mxu1 %v1069_v10  ;;  %s960_s26 = sshll.u32 %s1221_s10, 4  ;;  %s1072_s10 = scalar_lea.vmem %s1306_s12, 16 }
  0x1a   : > { %v948_v20 = vld [vmem:[%s1349_s4] ss:$0 sm:$0xff]  ;;  %s1304_s15 = scalar_lea.hbm %s1356_s11, %s960_s26  ;;  %p1073_p11 = scmp.ne.s32.totalorder %s1306_s12, %s1072_s10 }
  0x1b   : > { %984 = vmatpush3.bf16.msra.mxu0 %v1063_v1  ;;  %v1071_v35 = vld [vmem:[%s1352_s7] sm:$0xff]   ;;  %p1079_p0 = scmp.lt.s32.totalorder %s1306_s12, %s1077_s18 }
  0x1c   : > { %1020 = vmatprep.subr.msk.bf16.mxu0 %vm488_vm0, %v454_v3  ;;  %998 = vmatpush3.bf16.msra.mxu1 %v1069_v10  ;;  %v949_v38 = vld [vmem:[%s1351_s6] ss:$0 sm:$0xff]  ;;  %p1074_p12 = pnand %p1073_p11, %p1238_p5 }
  0x1d   : > { %1011 = vmatprep.subr.bf16.mxu1 %v1134_v51  ;;  %v954_v53 = vld [vmem:[%s1353_s8] ss:$0 sm:$0xff] }
  0x1e   : > { %986 = vmatmul.mubr.msk.bf16.vlgmr.msra.gmra.mxu0 %vm481_vm1, %v1065_v5  ;;  %v794_v5 = vld [vmem:[%s1354_s9] sm:$0x1]  ;;  %p1075_p13 = pneg %p1074_p12 }
  0x1f   : > { %990 = vmatpush3.bf16.msra.mxu0 %v559_v6  ;;  %991 = vmatprep.mubr.msk.bf16.mxu0 %vm551_vm2, %v1066_v7  ;;  %v798_v6 = vstv %s797_s23  ;;  %s1078_s23 = scalar_lea.vmem %s1077_s18, 32 }
  0x20   : > { %1003 = vmatprep.subr.bf16.mxu0 %v1070_v34  ;;  %p1080_p1 = scmp.lt.s32.totalorder %s1078_s23, %s1072_s10 }
  0x22   : > { %p1081_p2 = por %p1080_p1, %p1079_p0 }
  0x24   : > { %p1082_p3 = pnand %p1081_p2, %p1075_p13 }
  0x26   : > { %992 = vmatmul.mubr.msk.bf16.vlgmr.msra.gmra.mxu0 %vm551_vm2, %v1067_v8 }
  0x27   : > { %1004 = vmatpush3.bf16.msra.mxu0 %v1070_v34 }
  0x28   : > { %1005 = vmatprep.subr.bf16.mxu0 %v1071_v35 }
  0x2b   : > { %1006 = vmatpush3.bf16.msra.mxu0 %v1071_v35 }
  0xde   : > { %v987_v11 = vpop.f32.mrf.mxu0 }
  0xe0   : > { %v526_v12 = vpop.f32.mrf.mxu0 }
  0xe2   : > { %v988_v13 = vpop.f32.mrf.mxu0 }
  0xe4   : > { %v529_v14 = vpop.f32.mrf.mxu0 }
  0xe6   : > { %v993_v15 = vpop.f32.mrf.mxu0 }
  0xe7   : > { %v604_v18 = vadd.f32 %v993_v15, %v987_v11 }
  0xe8   : > { %v595_v16 = vpop.f32.mrf.mxu0 }
  0xe9   : > { %v596_v17 = vadd.f32 %v595_v16, %v526_v12  ;;  %v619_v26 = vadd.f32 %v948_v20, %v604_v18 }
  0xea   : > { %v994_v19 = vpop.f32.mrf.mxu0 }
  0xeb   : > { %v607_v21 = vadd.f32 %v994_v19, %v988_v13  ;;  %v617_v23 = vadd.f32 %v948_v20, %v596_v17  ;;  %v623_v31 = vmax.f32 %v619_v26, 0.0 }
  0xec   : > { %v598_v22 = vpop.f32.mrf.mxu0 }
  0xed   : > { %v620_v24 = vadd.f32 %v948_v20, %v607_v21  ;;  %v599_v25 = vadd.f32 %v598_v22, %v529_v14  ;;  %v621_v29 = vmax.f32 %v617_v23, 0.0 }
  0xef   : > { %v618_v27 = vadd.f32 %v948_v20, %v599_v25  ;;  %v624_v28 = vmax.f32 %v620_v24, 0.0 }
  0xf1   : > { %v622_v30 = vmax.f32 %v618_v27, 0.0  ;;  %v626_v33 = vpack.c.bf16 %v624_v28, %v623_v31 }
  0xf3   : > { %v625_v32 = vpack.c.bf16 %v622_v30, %v621_v29 }
  0xf5   : > { %999 = vmatprep.mubr.msk.bf16.mxu1 %vm650_vm3, %v625_v32 }
  0xf6   : > { %1000 = vmatmul.mubr.msk.bf16.vlgmr.msra.gmra.mxu1 %vm650_vm3, %v626_v33 }
  0xf7   : > { %1015 = vmatprep.mubr.msk.bf16.mxu1 %vm1135_vm4, %v1134_v51 }
 0x1b6   : > { %v1001_v36 = vpop.f32.mrf.mxu1 }
 0x1b7   : > { %v700_v42 = vadd.f32 %v1001_v36, %v949_v38 }
 0x1b8   : > { %v691_v37 = vpop.f32.mrf.mxu1 }
 0x1b9   : > { %v692_v40 = vadd.f32 %v949_v38, %v691_v37  ;;  %v708_v48 = vmax.f32 %v700_v42, 0.0 }
 0x1ba   : > { %v1002_v39 = vpop.f32.mrf.mxu1 }
 0x1bb   : > { %v703_v41 = vadd.f32 %v1002_v39, %v949_v38  ;;  %v706_v46 = vmax.f32 %v692_v40, 0.0 }
 0x1bc   : > { %v694_v43 = vpop.f32.mrf.mxu1 }
 0x1bd   : > { %v695_v44 = vadd.f32 %v949_v38, %v694_v43  ;;  %v709_v45 = vmax.f32 %v703_v41, 0.0 }
 0x1bf   : > { %v707_v47 = vmax.f32 %v695_v44, 0.0  ;;  %v711_v50 = vpack.c.bf16 %v709_v45, %v708_v48 }
 0x1c1   : > { %v710_v49 = vpack.c.bf16 %v707_v47, %v706_v46 }
 0x1c3   : > { %1007 = vmatprep.mubr.msk.bf16.mxu0 %vm650_vm3, %v710_v49 }
 0x1c4   : > { %1008 = vmatmul.mubr.msk.bf16.vlgmr.msra.gmra.mxu0 %vm650_vm3, %v711_v50 }
 0x284   : > { %v1009_v52 = vpop.f32.mrf.mxu0 }
 0x285   : > { %v784_v55 = vadd.f32 %v1009_v52, %v954_v53 }
 0x286   : > { %v775_v54 = vpop.f32.mrf.mxu0 }
 0x287   : > { %v792_v59 = vmax.f32 %v784_v55, 0.0  ;;  %v776_v62 = vadd.f32 %v954_v53, %v775_v54 }
 0x288   : > { %v1010_v56 = vpop.f32.mrf.mxu0 }
 0x289   : > { %v787_v57 = vadd.f32 %v1010_v56, %v954_v53  ;;  %v790_v2 = vmax.f32 %v776_v62, 0.0 }
 0x28a   : > { %v778_v58 = vpop.f32.mrf.mxu0 }
 0x28b   : > { %v793_v60 = vmax.f32 %v787_v57, 0.0  ;;  %v779_v61 = vadd.f32 %v954_v53, %v778_v58 }
 0x28d   : > { %v796_v63 = vpack.c.bf16 %v793_v60, %v792_v59  ;;  %v791_v0 = vmax.f32 %v779_v61, 0.0 }
 0x28f   : > { %v806_v1 = vsel %vm650_vm3, %v796_v63, 0  ;;  %v795_v3 = vpack.c.bf16 %v791_v0, %v790_v2 }
 0x290   : > { %1012 = vmatpush3.bf16.xpose.msra.mxu1 %v806_v1 }
 0x291   : > { %1013 = vmatprep.subr.bf16.mxu1 %v1134_v51  ;;  %v803_v4 = vsel %vm650_vm3, %v795_v3, 0 }
 0x298   : > { %1014 = vmatpush3.bf16.xpose.msra.mxu1 %v803_v4 }
 0x29f   : > { %1016 = vmatmul.mubr.msk.bf16.vlgmr.msra.gmra.mxu1 %vm650_vm3, %v794_v5 }
 0x35f   : > { %v842_v7 = vpop.f32.mrf.mxu1 }
 0x360   : > { %v843_v8 = vadd.f32 %v842_v7, %v798_v6 }
 0x361   : > { %v1017_v9 = vpop.f32.mrf.mxu1 }
 0x362   : > { %849 = vst.msk [vmem:[%s420_s30] sm:$0x1] %vm848_vm5, %v843_v8 }
 0x363   : > { %v845_v10 = vpop.f32.mrf.mxu1 }
 0x364   : > { %1085 = shalt.err (!%p1082_p3)
}
 0x365   : > { %s1086_s26 = scalar_lea.hbm %s1304_s15, 16  ;;  %s1090_s13 = scalar_lea.hbm %s1356_s11, 32 }
 0x366   : > { %p1087_p4 = scmp.ne.s32.totalorder %s1304_s15, %s1086_s26  ;;  %p1091_p9 = scmp.lt.s32.totalorder %s1304_s15, %s1356_s11 }
 0x367   : > { %p1092_p10 = scmp.lt.s32.totalorder %s1090_s13, %s1086_s26 }
 0x368   : > { %p1088_p7 = pnand %p1087_p4, %p1238_p5 }
 0x369   : > { %p1093_p11 = por %p1092_p10, %p1091_p9 }
 0x36a   : > { %p1089_p8 = pneg %p1088_p7 }
 0x36c   : > { %p1094_p12 = pnand %p1093_p11, %p1089_p8 }
 0x36e   : > { %1097 = shalt.err (!%p1094_p12)
}
 0x36f   : > { %1021 = dma.vmem_to_hbm [thread:$0]  (%p1238_p5), %s1306_s12, 16, %s1304_s15, %s851_s16   ;;  %v1018_v11 = vpop.f32.mrf.mxu1 }
 0x370 PF: > { %p1027_p13 = scmp.ge.s32.totalorder %s1132_s22, 2  ;;  %s875_s10 = sand.u32 1, %s1120_s19  }
 0x371   : > { %s876_s18 = scalar_lea.sflag [#allocation4], %s875_s10 }
 0x372   : > { %p1024_p0 = pnand %p1027_p13, %p1242_p6 }
 0x374   : > { %p1025_p1 = pneg %p1024_p0 }
 0x376   : > { %1115 = dma.done.wait (%p1025_p1), %s876_s18, 16  }
 0x377   : > { %1117 = vsyncadd (%p1025_p1), %s876_s18, 4294967280  ;;  %p22_p2 = scmp.ge.s32.totalorder %s1225_s24, 4   ;;  %s1359_s19 = smov %s1124_s20 }
 0x378   : > { %s1360_s20 = smov %s1128_s21  ;;  %s1361_s21 = smov %s1236_s27 }
 0x379   : > { %s1362_s22 = smov %s1225_s24  ;;  %24 = sbr.rel (!%p22_p2) target bundleno = 5 (0x5), region = 102 }
 0x37e   :  { %880 = vsyncpa [#allocation4], 1 }
 0x37f   :  { %882 = vsyncpa [#allocation4 + $0x1], 1 }

</bundles_post_ra>
